<compile_context>
chip_gen: v6e
topology: v6e:2x2x1
jax: 0.10.0
libtpu: 0.0.40
codegen_flags: <defaults>
</compile_context>

<pallas_src>
import jax
import jax.numpy as jnp
from jax.experimental import pallas as pl
from jax.experimental.pallas import tpu as pltpu


def _round_up(x, m):
    return ((x + m - 1) // m) * m


def _align_kernel(x_ref, c_ref, w1x_ref, w1c_ref, shift_ref, w2_ref, b2_ref,
                  out_ref):
    # conv1 on the 4x4 map (kernel 4, stride 4) == matmul of the flattened patch.
    h = jnp.dot(x_ref[...], w1x_ref[...], preferred_element_type=jnp.float32)
    # channel-concat of the (spatially constant) condition c == second matmul
    # against the spatially-summed conv1 weight slice.
    h = h + jnp.dot(c_ref[...], w1c_ref[...], preferred_element_type=jnp.float32)
    # folded conv1 bias + eval-mode BatchNorm shift
    h = h + shift_ref[...]
    # SiLU in f32 (sigmoid goes to EUP; safe on v5e which lacks bf16 VPU/EUP paths)
    h = h * jax.nn.sigmoid(h)
    # conv2 (1x1 kernel on a 1x1 spatial map) == plain matmul
    out = jnp.dot(h.astype(w2_ref.dtype), w2_ref[...],
                  preferred_element_type=jnp.float32)
    out_ref[...] = (out + b2_ref[...]).astype(out_ref.dtype)


def align_cond_discriminator(x, c, params, *, block_n=1024,
                             compute_dtype=jnp.float32):
    """x: [N, 8*in_chans, 4, 4], c: [N, condition_dim] -> squeeze([N, text_dim]).

    compute_dtype: jnp.float32 (exact) or jnp.bfloat16 (halves the HBM traffic on
    the dominant activation read; accumulation stays f32)."""
    N, Cx, H, W = x.shape
    assert H == 4 and W == 4
    cond_dim = c.shape[-1]
    Kx = Cx * 16

    w1 = params["w1"]           # [cond_dim, Cx + cond_dim, 4, 4]
    b1 = params["b1"]           # [cond_dim]
    gamma, beta = params["bn_gamma"], params["bn_beta"]
    rmean, rvar = params["bn_mean"], params["bn_var"]
    eps = 1e-5
    w2 = params["w2"]           # [text_dim, cond_dim, 1, 1]
    b2 = params["b2"]           # [text_dim]
    text_dim = w2.shape[0]

    cond_pad = _round_up(cond_dim, 128)
    text_pad = _round_up(text_dim, 128)

    # ---- glue (plain JAX): fold conv1 / BN / bias into weights + one shift ----
    s = gamma / jnp.sqrt(rvar + eps)                         # eval-mode BN scale
    w1x = (w1[:, :Cx, :, :].reshape(cond_dim, Kx) * s[:, None]).T   # [Kx, cond]
    w1c = (w1[:, Cx:, :, :].sum(axis=(2, 3)) * s[:, None]).T        # [cond, cond]
    shift = b1 * s + beta - rmean * s                        # folded bias + BN shift

    # lane-pad cond/text dims to 128 (exact: zero columns/rows, SiLU(0)=0)
    w1x_p = jnp.zeros((Kx, cond_pad), jnp.float32).at[:, :cond_dim].set(w1x)
    w1c_p = jnp.zeros((cond_dim, cond_pad), jnp.float32).at[:, :cond_dim].set(w1c)
    shift_p = jnp.zeros((1, cond_pad), jnp.float32).at[:, :cond_dim].set(shift[None, :])
    w2_p = jnp.zeros((cond_pad, text_pad), jnp.float32).at[:cond_dim, :text_dim].set(
        w2.reshape(text_dim, cond_dim).T)
    b2_p = jnp.zeros((1, text_pad), jnp.float32).at[:, :text_dim].set(b2[None, :])

    # activations: x reshape is a free view; c passed as-is (no HBM concat copy)
    x2d = x.reshape(N, Kx).astype(compute_dtype)
    c2d = c.astype(compute_dtype)
    w1x_p = w1x_p.astype(compute_dtype)
    w1c_p = w1c_p.astype(compute_dtype)
    w2_p = w2_p.astype(compute_dtype)

    # rows: pad only to a multiple of 8 (sublane); last tile may be partial
    n_rows = _round_up(N, 8)
    if n_rows != N:
        x2d = jnp.pad(x2d, ((0, n_rows - N), (0, 0)))
        c2d = jnp.pad(c2d, ((0, n_rows - N), (0, 0)))
    tn = min(block_n, n_rows)
    grid = (pl.cdiv(n_rows, tn),)

    itemsize = jnp.dtype(compute_dtype).itemsize
    cost = pl.CostEstimate(
        flops=2 * n_rows * (Kx * cond_pad + cond_dim * cond_pad
                            + cond_pad * text_pad),
        transcendentals=n_rows * cond_pad,
        bytes_accessed=(n_rows * (Kx + cond_dim) * itemsize
                        + (Kx * cond_pad + cond_dim * cond_pad
                           + cond_pad * text_pad) * itemsize
                        + n_rows * text_pad * 4),
    )

    out = pl.pallas_call(
        _align_kernel,
        out_shape=jax.ShapeDtypeStruct((n_rows, text_pad), jnp.float32),
        grid=grid,
        in_specs=[
            pl.BlockSpec((tn, Kx), lambda i: (i, 0)),              # x patch rows: tiled over N
            pl.BlockSpec((tn, cond_dim), lambda i: (i, 0)),        # condition rows: tiled over N
            pl.BlockSpec((Kx, cond_pad), lambda i: (0, 0)),        # fused conv1 weight (x part): resident
            pl.BlockSpec((cond_dim, cond_pad), lambda i: (0, 0)),  # fused conv1 weight (c part): resident
            pl.BlockSpec((1, cond_pad), lambda i: (0, 0)),         # folded bias + BN shift
            pl.BlockSpec((cond_pad, text_pad), lambda i: (0, 0)),  # conv2 weight
            pl.BlockSpec((1, text_pad), lambda i: (0, 0)),         # conv2 bias
        ],
        out_specs=pl.BlockSpec((tn, text_pad), lambda i: (i, 0)),
        compiler_params=pltpu.CompilerParams(
            dimension_semantics=("parallel",),
            vmem_limit_bytes=32 * 1024 * 1024,
        ),
        cost_estimate=cost,
    )(x2d, c2d, w1x_p, w1c_p, shift_p, w2_p, b2_p)

    # slice off batch/lane padding, then mimic torch's .squeeze()
    return jnp.squeeze(out[:N, :text_dim])


def _reference(x, c, params):
    """Pure-JAX reference following the PyTorch forward literally (eval-mode BN)."""
    N, Cx, H, W = x.shape
    cond_dim = c.shape[-1]
    eps = 1e-5
    c_rep = jnp.broadcast_to(c[:, :, None, None], (N, cond_dim, H, W))
    x_cat = jnp.concatenate([x, c_rep], axis=1)                 # [N, Cx+cond, 4, 4]
    h = jnp.einsum("nchw,ochw->no", x_cat, params["w1"]) + params["b1"]
    h = (h - params["bn_mean"]) / jnp.sqrt(params["bn_var"] + eps)
    h = h * params["bn_gamma"] + params["bn_beta"]
    h = h * jax.nn.sigmoid(h)
    text_dim = params["w2"].shape[0]
    out = h @ params["w2"].reshape(text_dim, cond_dim).T + params["b2"]
    return jnp.squeeze(out)


if __name__ == "__main__":
    # small shapes consistent with the module
    in_chans = 4
    condition_dim = 32
    text_embedding_dim = 64
    N = 2
    Cx = in_chans * 8                      # = 32 channels in x

    key = jax.random.PRNGKey(0)
    kx, kc, kw1, kb1, kw2, kb2 = jax.random.split(key, 6)

    x = jax.random.normal(kx, (N, Cx, 4, 4), dtype=jnp.float32)
    c = jax.random.normal(kc, (N, condition_dim), dtype=jnp.float32)

    params = {
        "w1": 0.05 * jax.random.normal(kw1, (condition_dim, Cx + condition_dim, 4, 4),
                                       dtype=jnp.float32),
        "b1": 0.01 * jax.random.normal(kb1, (condition_dim,), dtype=jnp.float32),
        "bn_gamma": jnp.ones((condition_dim,), jnp.float32),
        "bn_beta": jnp.zeros((condition_dim,), jnp.float32),
        "bn_mean": jnp.zeros((condition_dim,), jnp.float32),
        "bn_var": jnp.ones((condition_dim,), jnp.float32),
        "w2": 0.05 * jax.random.normal(kw2, (text_embedding_dim, condition_dim, 1, 1),
                                       dtype=jnp.float32),
        "b2": 0.01 * jax.random.normal(kb2, (text_embedding_dim,), dtype=jnp.float32),
    }

    out = jax.block_until_ready(align_cond_discriminator(x, c, params))
    ref = jax.block_until_ready(_reference(x, c, params))

    assert out.shape == (N, text_embedding_dim), out.shape
    assert jnp.allclose(out, ref, atol=1e-4, rtol=1e-4), \
        float(jnp.max(jnp.abs(out - ref)))

    # bf16 activation/weight traffic path (accumulation stays f32) — looser tolerance
    out_bf16 = jax.block_until_ready(
        align_cond_discriminator(x, c, params, compute_dtype=jnp.bfloat16))
    assert jnp.allclose(out_bf16, ref, atol=3e-2, rtol=3e-2), \
        float(jnp.max(jnp.abs(out_bf16 - ref)))

    print("KERNEL_OK")
</pallas_src>

<mosaic_0001>
module attributes {stable_mosaic.version = 11 : i64} {
  func.func @_align_kernel(%arg0: i32, %arg1: memref<8x512xf32, #tpu.memory_space<vmem>>, %arg2: memref<8x32xf32, #tpu.memory_space<vmem>>, %arg3: memref<512x128xf32, #tpu.memory_space<vmem>>, %arg4: memref<32x128xf32, #tpu.memory_space<vmem>>, %arg5: memref<1x128xf32, #tpu.memory_space<vmem>>, %arg6: memref<128x128xf32, #tpu.memory_space<vmem>>, %arg7: memref<1x128xf32, #tpu.memory_space<vmem>>, %arg8: memref<8x128xf32, #tpu.memory_space<vmem>>) attributes {dimension_semantics = [#tpu.dimension_semantics<parallel>], iteration_bounds = array<i64: 1>, scalar_prefetch = 0 : i64, scratch_operands = 0 : i64, tpu.core_type = #tpu.core_type<tc>, window_params = [{transform_indices = @transform_0, window_bounds = array<i64: 8, 512>}, {transform_indices = @transform_1, window_bounds = array<i64: 8, 32>}, {pipeline_mode = #tpu.pipeline_mode<synchronous>, transform_indices = @transform_2, window_bounds = array<i64: 512, 128>}, {pipeline_mode = #tpu.pipeline_mode<synchronous>, transform_indices = @transform_3, window_bounds = array<i64: 32, 128>}, {pipeline_mode = #tpu.pipeline_mode<synchronous>, transform_indices = @transform_4, window_bounds = array<i64: 1, 128>}, {pipeline_mode = #tpu.pipeline_mode<synchronous>, transform_indices = @transform_5, window_bounds = array<i64: 128, 128>}, {pipeline_mode = #tpu.pipeline_mode<synchronous>, transform_indices = @transform_6, window_bounds = array<i64: 1, 128>}, {transform_indices = @transform_7, window_bounds = array<i64: 8, 128>}]} {
    %c0 = arith.constant 0 : index
    %c0_0 = arith.constant 0 : index
    %0 = vector.load %arg1[%c0, %c0_0] : memref<8x512xf32, #tpu.memory_space<vmem>>, vector<8x512xf32>
    %c0_1 = arith.constant 0 : index
    %c0_2 = arith.constant 0 : index
    %1 = vector.load %arg3[%c0_1, %c0_2] : memref<512x128xf32, #tpu.memory_space<vmem>>, vector<512x128xf32>
    %cst = arith.constant dense<0.000000e+00> : vector<8x128xf32>
    %2 = tpu.matmul %0, %1, %cst {dimension_numbers = #tpu.dot_dimension_numbers<[1], [0], [0], [1], [0, 0, 1, 1], [], []>} : vector<8x512xf32>, vector<512x128xf32>, vector<8x128xf32> -> vector<8x128xf32>
    %c0_3 = arith.constant 0 : index
    %c0_4 = arith.constant 0 : index
    %3 = vector.load %arg2[%c0_3, %c0_4] : memref<8x32xf32, #tpu.memory_space<vmem>>, vector<8x32xf32>
    %c0_5 = arith.constant 0 : index
    %c0_6 = arith.constant 0 : index
    %4 = vector.load %arg4[%c0_5, %c0_6] : memref<32x128xf32, #tpu.memory_space<vmem>>, vector<32x128xf32>
    %cst_7 = arith.constant dense<0.000000e+00> : vector<8x128xf32>
    %5 = tpu.matmul %3, %4, %cst_7 {dimension_numbers = #tpu.dot_dimension_numbers<[1], [0], [0], [1], [0, 0, 1, 1], [], []>} : vector<8x32xf32>, vector<32x128xf32>, vector<8x128xf32> -> vector<8x128xf32>
    %6 = arith.addf %2, %5 : vector<8x128xf32>
    %c0_8 = arith.constant 0 : index
    %c0_9 = arith.constant 0 : index
    %7 = vector.load %arg5[%c0_8, %c0_9] : memref<1x128xf32, #tpu.memory_space<vmem>>, vector<1x128xf32>
    %8 = vector.broadcast %7 : vector<1x128xf32> to vector<8x128xf32>
    %9 = arith.addf %6, %8 : vector<8x128xf32>
    %10 = arith.negf %9 : vector<8x128xf32>
    %11 = math.exp %10 : vector<8x128xf32>
    %cst_10 = arith.constant 1.000000e+00 : f32
    %12 = vector.broadcast %cst_10 : f32 to vector<8x128xf32>
    %13 = arith.addf %12, %11 : vector<8x128xf32>
    %14 = arith.divf %12, %13 : vector<8x128xf32>
    %15 = arith.mulf %9, %14 : vector<8x128xf32>
    %c0_11 = arith.constant 0 : index
    %c0_12 = arith.constant 0 : index
    %16 = vector.load %arg6[%c0_11, %c0_12] : memref<128x128xf32, #tpu.memory_space<vmem>>, vector<128x128xf32>
    %cst_13 = arith.constant dense<0.000000e+00> : vector<8x128xf32>
    %17 = tpu.matmul %15, %16, %cst_13 {dimension_numbers = #tpu.dot_dimension_numbers<[1], [0], [0], [1], [0, 0, 1, 1], [], []>} : vector<8x128xf32>, vector<128x128xf32>, vector<8x128xf32> -> vector<8x128xf32>
    %c0_14 = arith.constant 0 : index
    %c0_15 = arith.constant 0 : index
    %18 = vector.load %arg7[%c0_14, %c0_15] : memref<1x128xf32, #tpu.memory_space<vmem>>, vector<1x128xf32>
    %19 = vector.broadcast %18 : vector<1x128xf32> to vector<8x128xf32>
    %20 = arith.addf %17, %19 : vector<8x128xf32>
    %c0_16 = arith.constant 0 : index
    %c0_17 = arith.constant 0 : index
    %21 = vector.load %arg8[%c0_16, %c0_17] : memref<8x128xf32, #tpu.memory_space<vmem>>, vector<8x128xf32>
    tpu.vector_store %arg8[%c0_16, %c0_17], %20 {strides = array<i32>} : memref<8x128xf32, #tpu.memory_space<vmem>>, vector<8x128xf32>,
    return
  }
  func.func @transform_0(%arg0: i32) -> (i32, i32) {
    %c0_i32 = arith.constant 0 : i32
    %c0_i32_0 = arith.constant 0 : i32
    return %arg0, %c0_i32 : i32, i32
  }
  func.func @transform_1(%arg0: i32) -> (i32, i32) {
    %c0_i32 = arith.constant 0 : i32
    %c0_i32_0 = arith.constant 0 : i32
    return %arg0, %c0_i32 : i32, i32
  }
  func.func @transform_2(%arg0: i32) -> (i32, i32) {
    %c0_i32 = arith.constant 0 : i32
    %c0_i32_0 = arith.constant 0 : i32
    %c0_i32_1 = arith.constant 0 : i32
    return %c0_i32, %c0_i32_0 : i32, i32
  }
  func.func @transform_3(%arg0: i32) -> (i32, i32) {
    %c0_i32 = arith.constant 0 : i32
    %c0_i32_0 = arith.constant 0 : i32
    %c0_i32_1 = arith.constant 0 : i32
    return %c0_i32, %c0_i32_0 : i32, i32
  }
  func.func @transform_4(%arg0: i32) -> (i32, i32) {
    %c0_i32 = arith.constant 0 : i32
    %c0_i32_0 = arith.constant 0 : i32
    %c0_i32_1 = arith.constant 0 : i32
    return %c0_i32, %c0_i32_0 : i32, i32
  }
  func.func @transform_5(%arg0: i32) -> (i32, i32) {
    %c0_i32 = arith.constant 0 : i32
    %c0_i32_0 = arith.constant 0 : i32
    %c0_i32_1 = arith.constant 0 : i32
    return %c0_i32, %c0_i32_0 : i32, i32
  }
  func.func @transform_6(%arg0: i32) -> (i32, i32) {
    %c0_i32 = arith.constant 0 : i32
    %c0_i32_0 = arith.constant 0 : i32
    %c0_i32_1 = arith.constant 0 : i32
    return %c0_i32, %c0_i32_0 : i32, i32
  }
  func.func @transform_7(%arg0: i32) -> (i32, i32) {
    %c0_i32 = arith.constant 0 : i32
    %c0_i32_0 = arith.constant 0 : i32
    return %arg0, %c0_i32 : i32, i32
  }
}

</mosaic_0001>

<bundles_post_ra>
// kernel: tpu_custom_call.1
= control target key start
LH: loop header
LB: loop body
LE: loop exit
PB: predicated region body
PF: predicated region fallthrough
CT: control target
= control target key end

     0   :  { %12 = vsyncpa [#allocation3], 0  ;;  %s895_s0 = inlined_call_operand.hbm [shape: f32[8,512], index: 0, kind: input, shape index: {}]   ;;  %s896_s1 = inlined_call_operand.hbm [shape: f32[8,32], index: 1, kind: input, shape index: {}]   ;;  %s897_s2 = inlined_call_operand.hbm [shape: f32[512,128], index: 2, kind: input, shape index: {}]   ;;  %s898_s3 = inlined_call_operand.hbm [shape: f32[32,128], index: 3, kind: input, shape index: {}]   ;;  %s899_s4 = inlined_call_operand.vmem [shape: f32[1,128], index: 4, kind: input, shape index: {}]   ;;  %s900_s5 = inlined_call_operand.hbm [shape: f32[128,128], index: 5, kind: input, shape index: {}]   ;;  %s901_s6 = inlined_call_operand.vmem [shape: f32[1,128], index: 6, kind: input, shape index: {}]   ;;  %s902_s7 = inlined_call_operand.hbm [shape: f32[8,128], index: 7, kind: output, shape index: {}]  }
   0x1   :  { %13 = vsyncpa [#allocation6], 0 }
   0x2   :  { %14 = vsyncpa [#allocation9], 0 }
   0x3   :  { %15 = vsyncpa [#allocation4], 0  ;;  %s788_s24 = smov [#allocation5]  }
   0x4   :  { %s32_s25 = sshll.u32 %s788_s24, 4  ;;  %s33_s25 = int_to_ptr.vmem [resolvable:$true] %s32_s25 }
   0x5   :  { %s668_s26 = scalar_lea.vmem %s33_s25, 128  ;;  %p673_p1 = scmp.lt.s32.totalorder %s33_s25, %s33_s25 }
   0x6   :  { %p669_p0 = scmp.ne.s32.totalorder %s33_s25, %s668_s26  ;;  %p674_p2 = scmp.lt.s32.totalorder %s668_s26, %s668_s26 }
   0x8   :  { %p675_p3 = por %p674_p2, %p673_p1 }
   0xa   :  { %p676_p4 = pnand %p675_p3, %p669_p0 }
   0xc   :  { %679 = shalt.err (!%p676_p4)
}
   0xd   :  { %35 = dma.hbm_to_vmem [thread:$0]  %s896_s1, 128, %s33_s25, [#allocation6]  }
   0xe   :  { %s789_s29 = smov [#allocation8]   ;;  %s790_s8 = smov [#allocation2]  }
   0xf   :  { %s53_s30 = sshll.u32 %s789_s29, 4  ;;  %s22_s9 = sshll.u32 %s790_s8, 4  ;;  %s54_s30 = int_to_ptr.vmem [resolvable:$true] %s53_s30  ;;  %s23_s9 = int_to_ptr.vmem [resolvable:$true] %s22_s9 }
  0x10   :  { %s688_s10 = scalar_lea.vmem %s54_s30, 512  ;;  %p693_p6 = scmp.lt.s32.totalorder %s54_s30, %s54_s30 }
  0x11   :  { %p689_p5 = scmp.ne.s32.totalorder %s54_s30, %s688_s10  ;;  %p694_p7 = scmp.lt.s32.totalorder %s688_s10, %s688_s10 }
  0x13   :  { %p695_p8 = por %p694_p7, %p693_p6 }
  0x15   :  { %p696_p9 = pnand %p695_p8, %p689_p5 }
  0x17   :  { %699 = shalt.err (!%p696_p9)
}
  0x18   :  { %s791_s11 = smov 128   ;;  %s792_s12 = smov 8  }
  0x19   :  { %59 = dma.hbm_to_vmem [thread:$0]  %s898_s3, 512, %s54_s30, [#allocation9], %s791_s11, %s791_s11, %s792_s12  }
  0x1a   :  { %s708_s1 = scalar_lea.vmem %s23_s9, 512  ;;  %p713_p11 = scmp.lt.s32.totalorder %s23_s9, %s23_s9 }
  0x1b   :  { %p709_p10 = scmp.ne.s32.totalorder %s23_s9, %s708_s1  ;;  %p714_p12 = scmp.lt.s32.totalorder %s708_s1, %s708_s1 }
  0x1d   :  { %p715_p13 = por %p714_p12, %p713_p11 }
  0x1f   :  { %p716_p0 = pnand %p715_p13, %p709_p10 }
  0x21   :  { %719 = shalt.err (!%p716_p0)
}
  0x22   :  { %25 = dma.hbm_to_vmem [thread:$0]  %s895_s0, 512, %s23_s9, [#allocation3]  }
  0x23   :  { %s793_s17 = smov [#allocation7]   ;;  %s794_s19 = smov [#allocation10]  }
  0x24   :  { %s41_s18 = sshll.u32 %s793_s17, 4  ;;  %s67_s20 = sshll.u32 %s794_s19, 4  ;;  %s42_s18 = int_to_ptr.vmem [resolvable:$true] %s41_s18  ;;  %s68_s20 = int_to_ptr.vmem [resolvable:$true] %s67_s20 }
  0x25   :  { %s728_s21 = scalar_lea.vmem %s42_s18, 8192  ;;  %p733_p2 = scmp.lt.s32.totalorder %s42_s18, %s42_s18 }
  0x26   :  { %p729_p1 = scmp.ne.s32.totalorder %s42_s18, %s728_s21  ;;  %p734_p3 = scmp.lt.s32.totalorder %s728_s21, %s728_s21 }
  0x28   :  { %p735_p4 = por %p734_p3, %p733_p2 }
  0x2a   :  { %p736_p5 = pnand %p735_p4, %p729_p1 }
  0x2c   :  { %739 = shalt.err (!%p736_p5)
}
  0x2d   :  { %47 = dma.hbm_to_vmem [thread:$0]  %s897_s2, 8192, %s42_s18, [#allocation6], %s791_s11, %s791_s11, %s792_s12  }
  0x2e   :  { %s748_s0 = scalar_lea.vmem %s68_s20, 2048  ;;  %p753_p7 = scmp.lt.s32.totalorder %s68_s20, %s68_s20 }
  0x2f   :  { %p749_p6 = scmp.ne.s32.totalorder %s68_s20, %s748_s0  ;;  %p754_p8 = scmp.lt.s32.totalorder %s748_s0, %s748_s0 }
  0x31   :  { %p755_p9 = por %p754_p8, %p753_p7 }
  0x33   :  { %p756_p10 = pnand %p755_p9, %p749_p6 }
  0x35   :  { %759 = shalt.err (!%p756_p10)
}
  0x36   :  { %73 = dma.hbm_to_vmem [thread:$0]  %s900_s5, 2048, %s68_s20, [#allocation9], %s791_s11, %s791_s11, %s792_s12  }
  0x37   :  { %780 = dma.done.wait [#allocation3], 512  }
  0x38   :  { %781 = vsyncadd [#allocation3], 4294966784 }
  0x39   :  { %782 = dma.done.wait [#allocation6], 8320  }
  0x3a   :  { %783 = vsyncadd [#allocation6], 4294958976 }
  0x3b   :  { %784 = dma.done.wait [#allocation9], 2560  }
  0x3c   :  { %785 = vsyncadd [#allocation9], 4294964736  ;;  %v795_v0 = vmov 0.0   ;;  %vm796_vm0 = vmmov 0   ;;  %v163_v1 = vld [vmem:[#allocation8 + $0x18] sm:$0xff]  ;;  %v162_v4 = vld [vmem:[#allocation8 + $0x10] sm:$0xff] }
  0x3d   :  { %600 = vmatprep.subr.mxu0 %v795_v0  ;;  %608 = vmatprep.mubr.msk.f32.mxu0 %vm796_vm0, %v795_v0  ;;  %v126_v2 = vld [vmem:[#allocation7 + $0xf8] sm:$0xff]  ;;  %v125_v5 = vld [vmem:[#allocation7 + $0xf0] sm:$0xff]  ;;  %v161_v7 = vld [vmem:[#allocation8 + $0x8] sm:$0xff]  ;;  %vm164_vm1 = vcmask 261120   ;;  %s797_s27 = smov [#allocation11]  }
  0x3e   :  { %v110_v3 = vld [vmem:[#allocation7 + $0x78] sm:$0xff]  ;;  %601 = vmatpush3.msra.mxu0 %v163_v1  ;;  %513 = vmatprep.subr.mxu1 %v126_v2  ;;  %v109_v6 = vld [vmem:[#allocation7 + $0x70] sm:$0xff]  ;;  %v124_v8 = vld [vmem:[#allocation7 + $0xe8] sm:$0xff]  ;;  %s493_s28 = sshll.u32 %s797_s27, 4  ;;  %s494_s28 = int_to_ptr.vmem [resolvable:$true] %s493_s28 }
  0x3f   :  { %602 = vmatprep.subr.mxu0 %v795_v0  ;;  %514 = vmatpush3.msra.mxu1 %v110_v3  ;;  %v108_v9 = vld [vmem:[#allocation7 + $0x68] sm:$0xff]  ;;  %v160_v10 = vld [vmem:[#allocation8] sm:$0xff]  ;;  %v159_v12 = vld [vmem:[#allocation5] sm:$0xff]  ;;  %p765_p12 = scmp.lt.s32.totalorder %s494_s28, %s494_s28 }
  0x40   :  { %603 = vmatpush3.msra.mxu0 %v162_v4  ;;  %515 = vmatprep.subr.mxu1 %v125_v5  ;;  %v123_v11 = vld [vmem:[#allocation7 + $0xe0] sm:$0xff]  ;;  %v158_v14 = vld [vmem:[#allocation7 + $0x1f8] sm:$0xff]  ;;  %v157_v18 = vld [vmem:[#allocation7 + $0x1f0] sm:$0xff] }
  0x41   :  { %604 = vmatprep.subr.mxu0 %v795_v0  ;;  %516 = vmatpush3.msra.mxu1 %v109_v6  ;;  %v107_v13 = vld [vmem:[#allocation7 + $0x60] sm:$0xff]  ;;  %v122_v15 = vld [vmem:[#allocation7 + $0xd8] sm:$0xff]  ;;  %v121_v19 = vld [vmem:[#allocation7 + $0xd0] sm:$0xff] }
  0x42   :  { %605 = vmatpush3.msra.mxu0 %v161_v7  ;;  %517 = vmatprep.subr.mxu1 %v124_v8  ;;  %v142_v16 = vld [vmem:[#allocation7 + $0x178] sm:$0xff]  ;;  %v141_v20 = vld [vmem:[#allocation7 + $0x170] sm:$0xff]  ;;  %v156_v22 = vld [vmem:[#allocation7 + $0x1e8] sm:$0xff] }
  0x43   :  { %606 = vmatprep.subr.mxu0 %v795_v0  ;;  %518 = vmatpush3.msra.mxu1 %v108_v9  ;;  %v106_v17 = vld [vmem:[#allocation7 + $0x58] sm:$0xff]  ;;  %v105_v21 = vld [vmem:[#allocation7 + $0x50] sm:$0xff]  ;;  %v120_v23 = vld [vmem:[#allocation7 + $0xc8] sm:$0xff] }
  0x44   :  { %607 = vmatpush3.msra.mxu0 %v160_v10  ;;  %519 = vmatprep.subr.mxu1 %v123_v11  ;;  %v140_v24 = vld [vmem:[#allocation7 + $0x168] sm:$0xff]  ;;  %v155_v26 = vld [vmem:[#allocation7 + $0x1e0] sm:$0xff]  ;;  %v154_v30 = vld [vmem:[#allocation7 + $0x1d8] sm:$0xff] }
  0x45   :  { %609 = vmatmul.mubr.msk.f32.vlgmr.msra.gmra.mxu0 %vm164_vm1, %v159_v12  ;;  %520 = vmatpush3.msra.mxu1 %v107_v13  ;;  %v104_v25 = vld [vmem:[#allocation7 + $0x48] sm:$0xff]  ;;  %v119_v27 = vld [vmem:[#allocation7 + $0xc0] sm:$0xff]  ;;  %v118_v31 = vld [vmem:[#allocation7 + $0xb8] sm:$0xff] }
  0x46   :  { %548 = vmatprep.subr.mxu0 %v158_v14  ;;  %521 = vmatprep.subr.mxu1 %v122_v15  ;;  %v139_v28 = vld [vmem:[#allocation7 + $0x160] sm:$0xff]  ;;  %v138_v32 = vld [vmem:[#allocation7 + $0x158] sm:$0xff]  ;;  %v153_v34 = vld [vmem:[#allocation7 + $0x1d0] sm:$0xff] }
  0x47   :  { %549 = vmatpush3.msra.mxu0 %v142_v16  ;;  %522 = vmatpush3.msra.mxu1 %v106_v17  ;;  %v103_v29 = vld [vmem:[#allocation7 + $0x40] sm:$0xff]  ;;  %v102_v33 = vld [vmem:[#allocation7 + $0x38] sm:$0xff]  ;;  %v117_v35 = vld [vmem:[#allocation7 + $0xb0] sm:$0xff] }
  0x48   :  { %550 = vmatprep.subr.mxu0 %v157_v18  ;;  %523 = vmatprep.subr.mxu1 %v121_v19  ;;  %v137_v36 = vld [vmem:[#allocation7 + $0x150] sm:$0xff]  ;;  %v152_v38 = vld [vmem:[#allocation7 + $0x1c8] sm:$0xff]  ;;  %v151_v42 = vld [vmem:[#allocation7 + $0x1c0] sm:$0xff] }
  0x49   :  { %551 = vmatpush3.msra.mxu0 %v141_v20  ;;  %524 = vmatpush3.msra.mxu1 %v105_v21  ;;  %v101_v37 = vld [vmem:[#allocation7 + $0x30] sm:$0xff]  ;;  %v116_v39 = vld [vmem:[#allocation7 + $0xa8] sm:$0xff]  ;;  %v115_v43 = vld [vmem:[#allocation7 + $0xa0] sm:$0xff] }
  0x4a   :  { %552 = vmatprep.subr.mxu0 %v156_v22  ;;  %525 = vmatprep.subr.mxu1 %v120_v23  ;;  %v136_v40 = vld [vmem:[#allocation7 + $0x148] sm:$0xff]  ;;  %v135_v44 = vld [vmem:[#allocation7 + $0x140] sm:$0xff]  ;;  %v150_v46 = vld [vmem:[#allocation7 + $0x1b8] sm:$0xff] }
  0x4b   :  { %553 = vmatpush3.msra.mxu0 %v140_v24  ;;  %526 = vmatpush3.msra.mxu1 %v104_v25  ;;  %v100_v41 = vld [vmem:[#allocation7 + $0x28] sm:$0xff]  ;;  %v99_v45 = vld [vmem:[#allocation7 + $0x20] sm:$0xff]  ;;  %v114_v47 = vld [vmem:[#allocation7 + $0x98] sm:$0xff] }
  0x4c   :  { %554 = vmatprep.subr.mxu0 %v155_v26  ;;  %527 = vmatprep.subr.mxu1 %v119_v27  ;;  %v134_v48 = vld [vmem:[#allocation7 + $0x138] sm:$0xff]  ;;  %v149_v50 = vld [vmem:[#allocation7 + $0x1b0] sm:$0xff]  ;;  %v148_v54 = vld [vmem:[#allocation7 + $0x1a8] sm:$0xff] }
  0x4d   :  { %555 = vmatpush3.msra.mxu0 %v139_v28  ;;  %528 = vmatpush3.msra.mxu1 %v103_v29  ;;  %v98_v49 = vld [vmem:[#allocation7 + $0x18] sm:$0xff]  ;;  %v113_v51 = vld [vmem:[#allocation7 + $0x90] sm:$0xff]  ;;  %v112_v55 = vld [vmem:[#allocation7 + $0x88] sm:$0xff] }
  0x4e   :  { %556 = vmatprep.subr.mxu0 %v154_v30  ;;  %529 = vmatprep.subr.mxu1 %v118_v31  ;;  %v133_v52 = vld [vmem:[#allocation7 + $0x130] sm:$0xff]  ;;  %v132_v56 = vld [vmem:[#allocation7 + $0x128] sm:$0xff]  ;;  %v147_v58 = vld [vmem:[#allocation7 + $0x1a0] sm:$0xff] }
  0x4f   :  { %557 = vmatpush3.msra.mxu0 %v138_v32  ;;  %530 = vmatpush3.msra.mxu1 %v102_v33  ;;  %v97_v53 = vld [vmem:[#allocation7 + $0x10] sm:$0xff]  ;;  %v96_v57 = vld [vmem:[#allocation7 + $0x8] sm:$0xff]  ;;  %v111_v59 = vld [vmem:[#allocation7 + $0x80] sm:$0xff] }
  0x50   :  { %558 = vmatprep.subr.mxu0 %v153_v34  ;;  %531 = vmatprep.subr.mxu1 %v117_v35  ;;  %v131_v60 = vld [vmem:[#allocation7 + $0x120] sm:$0xff]  ;;  %v146_v63 = vld [vmem:[#allocation7 + $0x198] sm:$0xff]  ;;  %v145_v3 = vld [vmem:[#allocation7 + $0x190] sm:$0xff] }
  0x51   :  { %559 = vmatpush3.msra.mxu0 %v137_v36  ;;  %532 = vmatpush3.msra.mxu1 %v101_v37  ;;  %v95_v61 = vld [vmem:[#allocation7] sm:$0xff]  ;;  %v91_v1 = vld [vmem:[#allocation2] sm:$0xff]  ;;  %v94_v4 = vld [vmem:[#allocation2 + $0x18] sm:$0xff] }
  0x52   :  { %560 = vmatprep.subr.mxu0 %v152_v38  ;;  %533 = vmatprep.subr.mxu1 %v116_v39  ;;  %v92_v62 = vld [vmem:[#allocation2 + $0x8] sm:$0xff]  ;;  %v130_v2 = vld [vmem:[#allocation7 + $0x118] sm:$0xff]  ;;  %v129_v5 = vld [vmem:[#allocation7 + $0x110] sm:$0xff] }
  0x53   :  { %561 = vmatpush3.msra.mxu0 %v136_v40  ;;  %534 = vmatpush3.msra.mxu1 %v100_v41  ;;  %v144_v6 = vld [vmem:[#allocation7 + $0x188] sm:$0xff]  ;;  %v143_v8 = vld [vmem:[#allocation7 + $0x180] sm:$0xff]  ;;  %v408_v11 = vld [vmem:[#allocation10 + $0x78] sm:$0xff] }
  0x54   :  { %562 = vmatprep.subr.mxu0 %v151_v42  ;;  %535 = vmatprep.subr.mxu1 %v115_v43  ;;  %v128_v7 = vld [vmem:[#allocation7 + $0x108] sm:$0xff]  ;;  %v127_v9 = vld [vmem:[#allocation7 + $0x100] sm:$0xff]  ;;  %v407_v12 = vld [vmem:[#allocation10 + $0x70] sm:$0xff] }
  0x55   :  { %563 = vmatpush3.msra.mxu0 %v135_v44  ;;  %536 = vmatpush3.msra.mxu1 %v99_v45  ;;  %v93_v10 = vld [vmem:[#allocation2 + $0x10] sm:$0xff]  ;;  %v405_v14 = vld [vmem:[#allocation10 + $0x60] sm:$0xff]  ;;  %v404_v15 = vld [vmem:[#allocation10 + $0x58] sm:$0xff] }
  0x56   :  { %564 = vmatprep.subr.mxu0 %v150_v46  ;;  %537 = vmatprep.subr.mxu1 %v114_v47  ;;  %v406_v13 = vld [vmem:[#allocation10 + $0x68] sm:$0xff]  ;;  %v403_v16 = vld [vmem:[#allocation10 + $0x50] sm:$0xff]  ;;  %v401_v18 = vld [vmem:[#allocation10 + $0x40] sm:$0xff] }
  0x57   :  { %565 = vmatpush3.msra.mxu0 %v134_v48  ;;  %538 = vmatpush3.msra.mxu1 %v98_v49  ;;  %v402_v17 = vld [vmem:[#allocation10 + $0x48] sm:$0xff]  ;;  %v400_v19 = vld [vmem:[#allocation10 + $0x38] sm:$0xff]  ;;  %v399_v20 = vld [vmem:[#allocation10 + $0x30] sm:$0xff] }
  0x58   :  { %566 = vmatprep.subr.mxu0 %v149_v50  ;;  %539 = vmatprep.subr.mxu1 %v113_v51  ;;  %v398_v21 = vld [vmem:[#allocation10 + $0x28] sm:$0xff]  ;;  %v397_v22 = vld [vmem:[#allocation10 + $0x20] sm:$0xff]  ;;  %v396_v23 = vld [vmem:[#allocation10 + $0x18] sm:$0xff] }
  0x59   :  { %567 = vmatpush3.msra.mxu0 %v133_v52  ;;  %540 = vmatpush3.msra.mxu1 %v97_v53  ;;  %v395_v24 = vld [vmem:[#allocation10 + $0x10] sm:$0xff]  ;;  %v394_v25 = vld [vmem:[#allocation10 + $0x8] sm:$0xff]  ;;  %v393_v26 = vld [vmem:[#allocation10] sm:$0xff] }
  0x5a   :  { %568 = vmatprep.subr.mxu0 %v148_v54  ;;  %541 = vmatprep.subr.mxu1 %v112_v55  ;;  %v505_v36 = vld [vmem:[%s899_s4] ss:$0 sm:$0xff]  ;;  %s760_s4 = scalar_lea.vmem %s494_s28, 128 }
  0x5b   :  { %569 = vmatpush3.msra.mxu0 %v132_v56  ;;  %542 = vmatpush3.msra.mxu1 %v96_v57  ;;  %v507_v43 = vld [vmem:[%s901_s6] ss:$0 sm:$0xff]  ;;  %p761_p11 = scmp.ne.s32.totalorder %s494_s28, %s760_s4  ;;  %p766_p13 = scmp.lt.s32.totalorder %s760_s4, %s760_s4 }
  0x5c   :  { %570 = vmatprep.subr.mxu0 %v147_v58  ;;  %543 = vmatprep.subr.mxu1 %v111_v59 }
  0x5d   :  { %571 = vmatpush3.msra.mxu0 %v131_v60  ;;  %544 = vmatpush3.msra.mxu1 %v95_v61  ;;  %p767_p0 = por %p766_p13, %p765_p12 }
  0x5e   :  { %302 = vmatprep.mubr.f32.mxu1 %v92_v62  ;;  %572 = vmatprep.subr.mxu0 %v146_v63 }
  0x5f   :  { %303 = vmatmul.mubr.f32.vlgmr.msra.gmra.mxu1 %v91_v1  ;;  %573 = vmatpush3.msra.mxu0 %v130_v2  ;;  %p768_p1 = pnand %p767_p0, %p761_p11 }
  0x60   :  { %574 = vmatprep.subr.mxu0 %v145_v3  ;;  %372 = vmatprep.mubr.f32.mxu0 %v94_v4 }
  0x61   :  { %575 = vmatpush3.msra.mxu0 %v129_v5  ;;  %611 = vmatprep.subr.mxu1 %v795_v0 }
  0x62   :  { %576 = vmatprep.subr.mxu0 %v144_v6  ;;  %643 = vmatprep.mubr.msk.f32.mxu1 %vm796_vm0, %v795_v0 }
  0x63   :  { %577 = vmatpush3.msra.mxu0 %v128_v7  ;;  %612 = vmatpush3.msra.mxu1 %v408_v11 }
  0x64   :  { %578 = vmatprep.subr.mxu0 %v143_v8  ;;  %613 = vmatprep.subr.mxu1 %v795_v0 }
  0x65   :  { %579 = vmatpush3.msra.mxu0 %v127_v9  ;;  %614 = vmatpush3.msra.mxu1 %v407_v12 }
  0x66   :  { %373 = vmatmul.mubr.f32.vlgmr.msra.gmra.mxu0 %v93_v10  ;;  %615 = vmatprep.subr.mxu1 %v795_v0 }
  0x67   :  { %616 = vmatpush3.msra.mxu1 %v406_v13 }
  0x68   :  { %617 = vmatprep.subr.mxu1 %v795_v0 }
  0x69   :  { %618 = vmatpush3.msra.mxu1 %v405_v14 }
  0x6a   :  { %619 = vmatprep.subr.mxu1 %v795_v0 }
  0x6b   :  { %620 = vmatpush3.msra.mxu1 %v404_v15 }
  0x6c   :  { %621 = vmatprep.subr.mxu1 %v795_v0 }
  0x6d   :  { %622 = vmatpush3.msra.mxu1 %v403_v16 }
  0x6e   :  { %623 = vmatprep.subr.mxu1 %v795_v0 }
  0x6f   :  { %624 = vmatpush3.msra.mxu1 %v402_v17 }
  0x70   :  { %625 = vmatprep.subr.mxu1 %v795_v0 }
  0x71   :  { %626 = vmatpush3.msra.mxu1 %v401_v18 }
  0x72   :  { %627 = vmatprep.subr.mxu1 %v795_v0 }
  0x73   :  { %628 = vmatpush3.msra.mxu1 %v400_v19 }
  0x74   :  { %629 = vmatprep.subr.mxu1 %v795_v0 }
  0x75   :  { %630 = vmatpush3.msra.mxu1 %v399_v20 }
  0x76   :  { %631 = vmatprep.subr.mxu1 %v795_v0 }
  0x77   :  { %632 = vmatpush3.msra.mxu1 %v398_v21 }
  0x78   :  { %633 = vmatprep.subr.mxu1 %v795_v0 }
  0x79   :  { %634 = vmatpush3.msra.mxu1 %v397_v22 }
  0x7a   :  { %635 = vmatprep.subr.mxu1 %v795_v0 }
  0x7b   :  { %636 = vmatpush3.msra.mxu1 %v396_v23 }
  0x7c   :  { %637 = vmatprep.subr.mxu1 %v795_v0 }
  0x7d   :  { %638 = vmatpush3.msra.mxu1 %v395_v24 }
  0x7e   :  { %639 = vmatprep.subr.mxu1 %v795_v0 }
  0x7f   :  { %640 = vmatpush3.msra.mxu1 %v394_v25 }
  0x80   :  { %641 = vmatprep.subr.mxu1 %v795_v0 }
  0x81   :  { %642 = vmatpush3.msra.mxu1 %v393_v26 }
 0x105   :  { %v234_v27 = vpop.f32.mrf.mxu0 }
 0x107   :  { %v610_v28 = vpop.f32.mrf.mxu0 }
 0x11f   :  { %v545_v29 = vpop.f32.mrf.mxu1 }
 0x121   :  { %v546_v30 = vpop.f32.mrf.mxu1 }
 0x122   :  { %v547_v31 = vadd.f32 %v546_v30, %v545_v29 }
 0x124   :  { %v305_v34 = vadd.f32 %v547_v31, %v234_v27 }
 0x126   :  { %v580_v32 = vpop.f32.mrf.mxu0 }
 0x128   :  { %v581_v33 = vpop.f32.mrf.mxu0 }
 0x129   :  { %v582_v35 = vadd.f32 %v581_v33, %v580_v32 }
 0x12b   :  { %v375_v37 = vadd.f32 %v582_v35, %v305_v34 }
 0x12d   :  { %v385_v38 = vadd.f32 %v505_v36, %v375_v37 }
 0x12f   :  { %v506_v39 = vmul.f32 -1.442695, %v385_v38 }
 0x131   :  { %656 = vpow2.f32 %v506_v39 }
 0x13e   :  { %v657_v0 = vpop.eup %656 }
 0x13f   :  { %v389_v40 = vadd.f32 1.0, %v657_v0 }
 0x141   :  { %658 = vrcp.f32 %v389_v40 }
 0x14e   :  { %v659_v41 = vpop.eup %658 }
 0x14f   :  { %v392_v42 = vmul.f32 %v659_v41, %v385_v38 }
 0x151   :  { %644 = vmatmul.mubr.f32.vlgmr.msra.gmra.mxu1 %v392_v42 }
 0x211   :  { %v482_v44 = vpop.f32.mrf.mxu1 }
 0x212   :  { %v483_v45 = vadd.f32 %v507_v43, %v482_v44 }
 0x213   :  { %v645_v46 = vpop.f32.mrf.mxu1 }
 0x214   :  { %486 = vst [vmem:[#allocation11] sm:$0xff] %v483_v45 }
 0x215   :  { %771 = shalt.err (!%p768_p1)
}
 0x216   :  { %496 = dma.vmem_to_hbm [thread:$0]  %s494_s28, 128, %s902_s7, [#allocation4]  }
 0x217   :  { %786 = dma.done.wait [#allocation4], 128  }
 0x218   :  { %787 = vsyncadd [#allocation4], 4294967168 }
 0x219   :  { %500 = vsyncpa [#allocation3], 1 }
 0x21a   :  { %501 = vsyncpa [#allocation6], 1 }
 0x21b   :  { %502 = vsyncpa [#allocation9], 1 }
 0x21c   :  { %503 = vsyncpa [#allocation4], 1 }

</bundles_post_ra>
